<compile_context>
chip_gen: v6e
topology: v6e:2x2x1
jax: 0.10.0
libtpu: 0.0.40
codegen_flags: <defaults>
</compile_context>

<pallas_src>
import jax
import jax.numpy as jnp
from jax.experimental import pallas as pl
from jax.experimental.pallas import tpu as pltpu


def _round_up(x, m):
    return (x + m - 1) // m * m


def _lane_pad(d):
    # 256-align big lane dims (v6e/v7x MXU is 2x256x256); 128 (v5e-native
    # minimum lane tile) for small dims so tiny demo weights are not inflated.
    return _round_up(d, 256) if d >= 256 else _round_up(d, 128)


# ---------------------------------------------------------------------------
# Pallas kernel: per-view patch-embed backbone + accumulated MLP classifier
# ---------------------------------------------------------------------------
def multiview_kernel(x1_ref, x2_ref,
                     we1_ref, be1_ref, we2_ref, be2_ref,
                     w1a_ref, w1b_ref, b1_ref, w2_ref, b2_ref,
                     out_ref):
    # Per grid step (batch tile TB):
    #   x1_ref  : [TB*P, K1] bf16   im2col'd patches, view 0
    #   x2_ref  : [TB*P, K2] bf16   im2col'd patches, view 1
    #   we?_ref : [K?, D?p]  bf16   patch-embed weight (per view)
    #   be?_ref : [1,  D?p]  f32
    #   w1a_ref : [D1p, Hp]  bf16   classifier layer-1 rows for view-0 features
    #   w1b_ref : [D2p, Hp]  bf16   classifier layer-1 rows for view-1 features
    #   b1_ref  : [1,  Hp]   f32
    #   w2_ref  : [Hp, Cp]   bf16
    #   b2_ref  : [1,  Cp]   f32
    #   out_ref : [TB, Cp]   f32
    tb = out_ref.shape[0]

    def view_features(x_ref, we_ref, be_ref):
        p = x_ref.shape[0] // tb
        # Patch-embed GEMM on the MXU (bf16 in, f32 accumulate).
        h = jnp.dot(x_ref[...], we_ref[...],
                    preferred_element_type=jnp.float32)
        h = jnp.maximum(h + be_ref[...], 0.0)            # bias + ReLU (f32 VPU)
        # Global mean pool over patches (non-minor-axis reduction -> XLU).
        # TODO(synk): for very large TB*P, chunk this GEMM+pool with
        # lax.fori_loop to bound the f32 `h` intermediate.
        f = jnp.sum(h.reshape(tb, p, h.shape[1]), axis=1) * (1.0 / p)
        return f.astype(jnp.bfloat16)                    # [TB, D?p]

    f1 = view_features(x1_ref, we1_ref, be1_ref)
    f2 = view_features(x2_ref, we2_ref, be2_ref)

    # classifier: Dropout(identity) -> Linear -> ReLU -> Dropout -> Linear.
    # concat([f1, f2], axis=1) @ w1 == f1 @ w1[:D1] + f2 @ w1[D1:].
    z = (jnp.dot(f1, w1a_ref[...], preferred_element_type=jnp.float32)
         + jnp.dot(f2, w1b_ref[...], preferred_element_type=jnp.float32)
         + b1_ref[...])
    z = jnp.maximum(z, 0.0).astype(jnp.bfloat16)
    logits = jnp.dot(z, w2_ref[...],
                     preferred_element_type=jnp.float32) + b2_ref[...]
    out_ref[...] = logits.astype(out_ref.dtype)


# ---------------------------------------------------------------------------
# JAX glue
# ---------------------------------------------------------------------------
def _to_patches(x_nchw, patch):
    """NCHW -> [B, P, C*p*p] im2col for a stride==kernel conv (patch embed)."""
    B, C, H, W = x_nchw.shape
    gh, gw = H // patch, W // patch
    x = x_nchw.reshape(B, C, gh, patch, gw, patch)
    x = jnp.transpose(x, (0, 2, 4, 1, 3, 5))             # [B, gh, gw, C, p, p]
    return x.reshape(B, gh * gw, C * patch * patch).astype(jnp.float32)


def prepare_params(params, num_classes):
    """One-time weight prep (outside the per-call path): zero-pad lane dims
    and cast matmul operands to bf16."""
    D1 = params["we1"].shape[1]
    D2 = params["we2"].shape[1]
    Hd = params["w1"].shape[1]
    K1 = params["we1"].shape[0]
    K2 = params["we2"].shape[0]
    D1p, D2p = _lane_pad(D1), _lane_pad(D2)
    Hp, Cp = _lane_pad(Hd), _lane_pad(num_classes)

    def pad2(a, rows, cols):
        return jnp.pad(a, ((0, rows - a.shape[0]), (0, cols - a.shape[1])))

    return {
        "patch": params["patch"],
        "K1": K1, "K2": K2, "D1p": D1p, "D2p": D2p, "Hp": Hp, "Cp": Cp,
        "we1": pad2(params["we1"], K1, D1p).astype(jnp.bfloat16),
        "be1": pad2(params["be1"], 1, D1p).astype(jnp.float32),
        "we2": pad2(params["we2"], K2, D2p).astype(jnp.bfloat16),
        "be2": pad2(params["be2"], 1, D2p).astype(jnp.float32),
        "w1a": pad2(params["w1"][:D1], D1p, Hp).astype(jnp.bfloat16),
        "w1b": pad2(params["w1"][D1:], D2p, Hp).astype(jnp.bfloat16),
        "b1":  pad2(params["b1"], 1, Hp).astype(jnp.float32),
        "w2":  pad2(params["w2"], Hp, Cp).astype(jnp.bfloat16),
        "b2":  pad2(params["b2"], 1, Cp).astype(jnp.float32),
    }


def _vmem_budget_bytes():
    try:
        cap = pltpu.get_tpu_info().vmem_capacity_bytes   # 128 MiB v5e/v6e, 64 MiB v7x
    except Exception:
        cap = 64 * 1024 * 1024                           # conservative (v7x-safe)
    return int(cap * 0.7)                                # headroom for compiler scratch


def _derive_batch_tile(B, P, prep, vmem_budget, target_rows=1024):
    """Largest multiple-of-8 batch tile whose working set fits the VMEM budget
    and whose first-GEMM row count is ~target_rows."""
    K1, K2 = prep["K1"], prep["K2"]
    D1p, D2p, Hp, Cp = prep["D1p"], prep["D2p"], prep["Hp"], prep["Cp"]
    weight_bytes = 2 * sum(int(prep[k].size) * prep[k].dtype.itemsize
                           for k in ("we1", "be1", "we2", "be2",
                                     "w1a", "w1b", "b1", "w2", "b2"))
    # Per-sample bytes in one grid step: double-buffered bf16 activation tiles,
    # f32 post-ReLU intermediates (both views), feature rows, f32 output block.
    per_sample = (2 * 2 * P * (K1 + K2)
                  + 4 * P * (D1p + D2p)
                  + 2 * (D1p + D2p + Hp)
                  + 2 * 4 * Cp)
    tb_vmem = (vmem_budget - weight_bytes) // max(per_sample, 1)
    tb = int(min(tb_vmem, max(1, target_rows // max(P, 1))))
    tb = max(8, (tb // 8) * 8)                           # sublane multiple of 8
    tb = min(tb, _round_up(B, 8))                        # don't over-pad tiny batches
    return tb


def multiview_forward(inputs, prep, num_classes):
    """inputs: tuple of two NCHW views; prep: output of prepare_params."""
    x1, x2 = inputs
    patch = prep["patch"]
    B = x1.shape[0]

    # Wrapper-side im2col (patch extraction) + bf16 cast.
    # TODO(synk): at production sizes move this reshape/pad into the kernel
    # pipeline (BlockSpec over the raw NCHW input) to avoid an extra HBM pass.
    x1p = _to_patches(x1, patch).astype(jnp.bfloat16)    # [B, P, K1]
    x2p = _to_patches(x2, patch).astype(jnp.bfloat16)    # [B, P, K2]
    P = x1p.shape[1]
    K1, K2 = prep["K1"], prep["K2"]
    D1p, D2p, Hp, Cp = prep["D1p"], prep["D2p"], prep["Hp"], prep["Cp"]

    vmem_budget = _vmem_budget_bytes()
    TB = _derive_batch_tile(B, P, prep, vmem_budget)
    Bp = _round_up(B, TB)                                # TB always divides Bp
    grid = (Bp // TB,)

    pad_b = ((0, Bp - B), (0, 0), (0, 0))
    x1_flat = jnp.pad(x1p, pad_b).reshape(Bp * P, K1)    # K kept unpadded
    x2_flat = jnp.pad(x2p, pad_b).reshape(Bp * P, K2)

    weight_bytes = sum(int(prep[k].size) * prep[k].dtype.itemsize
                       for k in ("we1", "be1", "we2", "be2",
                                 "w1a", "w1b", "b1", "w2", "b2"))
    flops = (2 * Bp * P * (K1 * D1p + K2 * D2p)
             + 2 * Bp * ((D1p + D2p) * Hp + Hp * Cp))
    bytes_accessed = ((x1_flat.size + x2_flat.size) * 2
                      + Bp * Cp * 4 + weight_bytes)

    resident = lambda i: (0, 0)    # constant index_map -> weights stay VMEM-resident

    out_padded = pl.pallas_call(
        multiview_kernel,
        out_shape=jax.ShapeDtypeStruct((Bp, Cp), jnp.float32),
        grid=grid,
        in_specs=[
            pl.BlockSpec((TB * P, K1), lambda i: (i, 0)),   # activations: pipelined
            pl.BlockSpec((TB * P, K2), lambda i: (i, 0)),
            pl.BlockSpec((K1, D1p), resident),
            pl.BlockSpec((1, D1p), resident),
            pl.BlockSpec((K2, D2p), resident),
            pl.BlockSpec((1, D2p), resident),
            pl.BlockSpec((D1p, Hp), resident),
            pl.BlockSpec((D2p, Hp), resident),
            pl.BlockSpec((1, Hp), resident),
            pl.BlockSpec((Hp, Cp), resident),
            pl.BlockSpec((1, Cp), resident),
        ],
        out_specs=pl.BlockSpec((TB, Cp), lambda i: (i, 0)),
        compiler_params=pltpu.CompilerParams(
            dimension_semantics=("parallel",),     # batch tiles shard across TCs
            vmem_limit_bytes=vmem_budget),
        cost_estimate=pl.CostEstimate(flops=flops, transcendentals=0,
                                      bytes_accessed=bytes_accessed),
    )(x1_flat, x2_flat,
      prep["we1"], prep["be1"], prep["we2"], prep["be2"],
      prep["w1a"], prep["w1b"], prep["b1"], prep["w2"], prep["b2"])

    # Strip batch / class padding outside the kernel.
    return out_padded[:B, :num_classes]


def reference_f32(inputs, params):
    """Pure-JAX f32 reference matching the module's forward semantics."""
    x1, x2 = inputs
    patch = params["patch"]
    x1p = _to_patches(x1, patch)
    x2p = _to_patches(x2, patch)
    h1 = jnp.maximum(jnp.einsum("bpk,kd->bpd", x1p, params["we1"]) + params["be1"], 0.0)
    h2 = jnp.maximum(jnp.einsum("bpk,kd->bpd", x2p, params["we2"]) + params["be2"], 0.0)
    f = jnp.concatenate([jnp.mean(h1, axis=1), jnp.mean(h2, axis=1)], axis=1)
    z = jnp.maximum(f @ params["w1"] + params["b1"], 0.0)
    return z @ params["w2"] + params["b2"]


# ---------------------------------------------------------------------------
# Deterministic parameter construction (synthetic, no checkpoint load)
# ---------------------------------------------------------------------------
def make_params(key, in_ch1, in_ch2, patch, embed_dim, hidden, num_classes):
    k = jax.random.split(key, 8)
    K1 = in_ch1 * patch * patch
    K2 = in_ch2 * patch * patch
    fused = 2 * embed_dim
    s = lambda fan_in: 1.0 / jnp.sqrt(jnp.float32(fan_in))
    return {
        "patch": patch,
        # backbone 0 (patch-embed conv weights flattened [K, D])
        "we1": jax.random.normal(k[0], (K1, embed_dim), jnp.float32) * s(K1),
        "be1": jax.random.normal(k[1], (1, embed_dim), jnp.float32) * 0.01,
        # backbone 1
        "we2": jax.random.normal(k[2], (K2, embed_dim), jnp.float32) * s(K2),
        "be2": jax.random.normal(k[3], (1, embed_dim), jnp.float32) * 0.01,
        # classifier: Linear(fused, hidden) -> ReLU -> Linear(hidden, classes)
        "w1": jax.random.normal(k[4], (fused, hidden), jnp.float32) * s(fused),
        "b1": jax.random.normal(k[5], (1, hidden), jnp.float32) * 0.01,
        "w2": jax.random.normal(k[6], (hidden, num_classes), jnp.float32) * s(hidden),
        "b2": jax.random.normal(k[7], (1, num_classes), jnp.float32) * 0.01,
    }


if __name__ == "__main__":
    # Small shapes consistent with the module: 2 views of 1-channel (wrist
    # X-ray style) images, img_size=16, patch=4, embed_dim=32 per view,
    # classifier hidden=256 (as in the module), num_classes=2.
    B, C, H, W = 2, 1, 16, 16
    PATCH, EMBED, HIDDEN, NUM_CLASSES = 4, 32, 256, 2

    key = jax.random.PRNGKey(0)
    kx1, kx2, kp = jax.random.split(key, 3)
    view0 = jax.random.normal(kx1, (B, C, H, W), jnp.float32)   # NCHW
    view1 = jax.random.normal(kx2, (B, C, H, W), jnp.float32)   # NCHW
    params = make_params(kp, C, C, PATCH, EMBED, HIDDEN, NUM_CLASSES)

    # TODO(synk): timm pretrained backbones are replaced with a deterministic
    # synthetic patch-embed backbone; nn.Dropout is identity at inference.
    prep = prepare_params(params, NUM_CLASSES)   # one-time padded/bf16 weights

    fwd = jax.jit(lambda v0, v1: multiview_forward((v0, v1), prep, NUM_CLASSES))
    out = jax.block_until_ready(fwd(view0, view1))

    ref = reference_f32((view0, view1), params)
    assert out.shape == (B, NUM_CLASSES)
    err = jnp.max(jnp.abs(out - ref))
    # bf16 matmul operands with f32 accumulation vs an f32 reference.
    assert jnp.allclose(out, ref, atol=5e-2, rtol=5e-2), f"max abs err {err}"

    print("KERNEL_OK")
</pallas_src>

<mosaic_0001>
module attributes {stable_mosaic.version = 11 : i64} {
  func.func @multiview_kernel(%arg0: i32, %arg1: memref<128x16xbf16, #tpu.memory_space<vmem>>, %arg2: memref<128x16xbf16, #tpu.memory_space<vmem>>, %arg3: memref<16x128xbf16, #tpu.memory_space<vmem>>, %arg4: memref<1x128xf32, #tpu.memory_space<vmem>>, %arg5: memref<16x128xbf16, #tpu.memory_space<vmem>>, %arg6: memref<1x128xf32, #tpu.memory_space<vmem>>, %arg7: memref<128x256xbf16, #tpu.memory_space<vmem>>, %arg8: memref<128x256xbf16, #tpu.memory_space<vmem>>, %arg9: memref<1x256xf32, #tpu.memory_space<vmem>>, %arg10: memref<256x128xbf16, #tpu.memory_space<vmem>>, %arg11: memref<1x128xf32, #tpu.memory_space<vmem>>, %arg12: memref<8x128xf32, #tpu.memory_space<vmem>>) attributes {dimension_semantics = [#tpu.dimension_semantics<parallel>], iteration_bounds = array<i64: 1>, scalar_prefetch = 0 : i64, scratch_operands = 0 : i64, tpu.core_type = #tpu.core_type<tc>, window_params = [{transform_indices = @transform_0, window_bounds = array<i64: 128, 16>}, {transform_indices = @transform_1, window_bounds = array<i64: 128, 16>}, {pipeline_mode = #tpu.pipeline_mode<synchronous>, transform_indices = @transform_2, window_bounds = array<i64: 16, 128>}, {pipeline_mode = #tpu.pipeline_mode<synchronous>, transform_indices = @transform_3, window_bounds = array<i64: 1, 128>}, {pipeline_mode = #tpu.pipeline_mode<synchronous>, transform_indices = @transform_4, window_bounds = array<i64: 16, 128>}, {pipeline_mode = #tpu.pipeline_mode<synchronous>, transform_indices = @transform_5, window_bounds = array<i64: 1, 128>}, {pipeline_mode = #tpu.pipeline_mode<synchronous>, transform_indices = @transform_6, window_bounds = array<i64: 128, 256>}, {pipeline_mode = #tpu.pipeline_mode<synchronous>, transform_indices = @transform_7, window_bounds = array<i64: 128, 256>}, {pipeline_mode = #tpu.pipeline_mode<synchronous>, transform_indices = @transform_8, window_bounds = array<i64: 1, 256>}, {pipeline_mode = #tpu.pipeline_mode<synchronous>, transform_indices = @transform_9, window_bounds = array<i64: 256, 128>}, {pipeline_mode = #tpu.pipeline_mode<synchronous>, transform_indices = @transform_10, window_bounds = array<i64: 1, 128>}, {transform_indices = @transform_11, window_bounds = array<i64: 8, 128>}]} {
    %c0 = arith.constant 0 : index
    %c0_0 = arith.constant 0 : index
    %0 = vector.load %arg1[%c0, %c0_0] : memref<128x16xbf16, #tpu.memory_space<vmem>>, vector<128x16xbf16>
    %c0_1 = arith.constant 0 : index
    %c0_2 = arith.constant 0 : index
    %1 = vector.load %arg3[%c0_1, %c0_2] : memref<16x128xbf16, #tpu.memory_space<vmem>>, vector<16x128xbf16>
    %cst = arith.constant dense<0.000000e+00> : vector<128x128xf32>
    %2 = tpu.matmul %0, %1, %cst {dimension_numbers = #tpu.dot_dimension_numbers<[1], [0], [0], [1], [0, 0, 1, 1], [], []>} : vector<128x16xbf16>, vector<16x128xbf16>, vector<128x128xf32> -> vector<128x128xf32>
    %c0_3 = arith.constant 0 : index
    %c0_4 = arith.constant 0 : index
    %3 = vector.load %arg4[%c0_3, %c0_4] : memref<1x128xf32, #tpu.memory_space<vmem>>, vector<1x128xf32>
    %4 = vector.broadcast %3 : vector<1x128xf32> to vector<128x128xf32>
    %5 = arith.addf %2, %4 : vector<128x128xf32>
    %cst_5 = arith.constant 0.000000e+00 : f32
    %6 = vector.broadcast %cst_5 : f32 to vector<128x128xf32>
    %7 = arith.maximumf %5, %6 : vector<128x128xf32>
    %8 = vector.shape_cast %7 : vector<128x128xf32> to vector<8x16x128xf32>
    %cst_6 = arith.constant dense<0.000000e+00> : vector<8x128xf32>
    %9 = vector.multi_reduction <add>, %8, %cst_6 [1] : vector<8x16x128xf32> to vector<8x128xf32>
    %cst_7 = arith.constant 6.250000e-02 : f32
    %10 = vector.broadcast %cst_7 : f32 to vector<8x128xf32>
    %11 = arith.mulf %9, %10 : vector<8x128xf32>
    %12 = arith.truncf %11 : vector<8x128xf32> to vector<8x128xbf16>
    %c0_8 = arith.constant 0 : index
    %c0_9 = arith.constant 0 : index
    %13 = vector.load %arg2[%c0_8, %c0_9] : memref<128x16xbf16, #tpu.memory_space<vmem>>, vector<128x16xbf16>
    %c0_10 = arith.constant 0 : index
    %c0_11 = arith.constant 0 : index
    %14 = vector.load %arg5[%c0_10, %c0_11] : memref<16x128xbf16, #tpu.memory_space<vmem>>, vector<16x128xbf16>
    %cst_12 = arith.constant dense<0.000000e+00> : vector<128x128xf32>
    %15 = tpu.matmul %13, %14, %cst_12 {dimension_numbers = #tpu.dot_dimension_numbers<[1], [0], [0], [1], [0, 0, 1, 1], [], []>} : vector<128x16xbf16>, vector<16x128xbf16>, vector<128x128xf32> -> vector<128x128xf32>
    %c0_13 = arith.constant 0 : index
    %c0_14 = arith.constant 0 : index
    %16 = vector.load %arg6[%c0_13, %c0_14] : memref<1x128xf32, #tpu.memory_space<vmem>>, vector<1x128xf32>
    %17 = vector.broadcast %16 : vector<1x128xf32> to vector<128x128xf32>
    %18 = arith.addf %15, %17 : vector<128x128xf32>
    %cst_15 = arith.constant 0.000000e+00 : f32
    %19 = vector.broadcast %cst_15 : f32 to vector<128x128xf32>
    %20 = arith.maximumf %18, %19 : vector<128x128xf32>
    %21 = vector.shape_cast %20 : vector<128x128xf32> to vector<8x16x128xf32>
    %cst_16 = arith.constant dense<0.000000e+00> : vector<8x128xf32>
    %22 = vector.multi_reduction <add>, %21, %cst_16 [1] : vector<8x16x128xf32> to vector<8x128xf32>
    %cst_17 = arith.constant 6.250000e-02 : f32
    %23 = vector.broadcast %cst_17 : f32 to vector<8x128xf32>
    %24 = arith.mulf %22, %23 : vector<8x128xf32>
    %25 = arith.truncf %24 : vector<8x128xf32> to vector<8x128xbf16>
    %c0_18 = arith.constant 0 : index
    %c0_19 = arith.constant 0 : index
    %26 = vector.load %arg7[%c0_18, %c0_19] : memref<128x256xbf16, #tpu.memory_space<vmem>>, vector<128x256xbf16>
    %cst_20 = arith.constant dense<0.000000e+00> : vector<8x256xf32>
    %27 = tpu.matmul %12, %26, %cst_20 {dimension_numbers = #tpu.dot_dimension_numbers<[1], [0], [0], [1], [0, 0, 1, 1], [], []>} : vector<8x128xbf16>, vector<128x256xbf16>, vector<8x256xf32> -> vector<8x256xf32>
    %c0_21 = arith.constant 0 : index
    %c0_22 = arith.constant 0 : index
    %28 = vector.load %arg8[%c0_21, %c0_22] : memref<128x256xbf16, #tpu.memory_space<vmem>>, vector<128x256xbf16>
    %cst_23 = arith.constant dense<0.000000e+00> : vector<8x256xf32>
    %29 = tpu.matmul %25, %28, %cst_23 {dimension_numbers = #tpu.dot_dimension_numbers<[1], [0], [0], [1], [0, 0, 1, 1], [], []>} : vector<8x128xbf16>, vector<128x256xbf16>, vector<8x256xf32> -> vector<8x256xf32>
    %30 = arith.addf %27, %29 : vector<8x256xf32>
    %c0_24 = arith.constant 0 : index
    %c0_25 = arith.constant 0 : index
    %31 = vector.load %arg9[%c0_24, %c0_25] : memref<1x256xf32, #tpu.memory_space<vmem>>, vector<1x256xf32>
    %32 = vector.broadcast %31 : vector<1x256xf32> to vector<8x256xf32>
    %33 = arith.addf %30, %32 : vector<8x256xf32>
    %cst_26 = arith.constant 0.000000e+00 : f32
    %34 = vector.broadcast %cst_26 : f32 to vector<8x256xf32>
    %35 = arith.maximumf %33, %34 : vector<8x256xf32>
    %36 = arith.truncf %35 : vector<8x256xf32> to vector<8x256xbf16>
    %c0_27 = arith.constant 0 : index
    %c0_28 = arith.constant 0 : index
    %37 = vector.load %arg10[%c0_27, %c0_28] : memref<256x128xbf16, #tpu.memory_space<vmem>>, vector<256x128xbf16>
    %cst_29 = arith.constant dense<0.000000e+00> : vector<8x128xf32>
    %38 = tpu.matmul %36, %37, %cst_29 {dimension_numbers = #tpu.dot_dimension_numbers<[1], [0], [0], [1], [0, 0, 1, 1], [], []>} : vector<8x256xbf16>, vector<256x128xbf16>, vector<8x128xf32> -> vector<8x128xf32>
    %c0_30 = arith.constant 0 : index
    %c0_31 = arith.constant 0 : index
    %39 = vector.load %arg11[%c0_30, %c0_31] : memref<1x128xf32, #tpu.memory_space<vmem>>, vector<1x128xf32>
    %40 = vector.broadcast %39 : vector<1x128xf32> to vector<8x128xf32>
    %41 = arith.addf %38, %40 : vector<8x128xf32>
    %c0_32 = arith.constant 0 : index
    %c0_33 = arith.constant 0 : index
    %42 = vector.load %arg12[%c0_32, %c0_33] : memref<8x128xf32, #tpu.memory_space<vmem>>, vector<8x128xf32>
    tpu.vector_store %arg12[%c0_32, %c0_33], %41 {strides = array<i32>} : memref<8x128xf32, #tpu.memory_space<vmem>>, vector<8x128xf32>,
    return
  }
  func.func @transform_0(%arg0: i32) -> (i32, i32) {
    %c0_i32 = arith.constant 0 : i32
    %c0_i32_0 = arith.constant 0 : i32
    return %arg0, %c0_i32 : i32, i32
  }
  func.func @transform_1(%arg0: i32) -> (i32, i32) {
    %c0_i32 = arith.constant 0 : i32
    %c0_i32_0 = arith.constant 0 : i32
    return %arg0, %c0_i32 : i32, i32
  }
  func.func @transform_2(%arg0: i32) -> (i32, i32) {
    %c0_i32 = arith.constant 0 : i32
    %c0_i32_0 = arith.constant 0 : i32
    %c0_i32_1 = arith.constant 0 : i32
    return %c0_i32, %c0_i32_0 : i32, i32
  }
  func.func @transform_3(%arg0: i32) -> (i32, i32) {
    %c0_i32 = arith.constant 0 : i32
    %c0_i32_0 = arith.constant 0 : i32
    %c0_i32_1 = arith.constant 0 : i32
    return %c0_i32, %c0_i32_0 : i32, i32
  }
  func.func @transform_4(%arg0: i32) -> (i32, i32) {
    %c0_i32 = arith.constant 0 : i32
    %c0_i32_0 = arith.constant 0 : i32
    %c0_i32_1 = arith.constant 0 : i32
    return %c0_i32, %c0_i32_0 : i32, i32
  }
  func.func @transform_5(%arg0: i32) -> (i32, i32) {
    %c0_i32 = arith.constant 0 : i32
    %c0_i32_0 = arith.constant 0 : i32
    %c0_i32_1 = arith.constant 0 : i32
    return %c0_i32, %c0_i32_0 : i32, i32
  }
  func.func @transform_6(%arg0: i32) -> (i32, i32) {
    %c0_i32 = arith.constant 0 : i32
    %c0_i32_0 = arith.constant 0 : i32
    %c0_i32_1 = arith.constant 0 : i32
    return %c0_i32, %c0_i32_0 : i32, i32
  }
  func.func @transform_7(%arg0: i32) -> (i32, i32) {
    %c0_i32 = arith.constant 0 : i32
    %c0_i32_0 = arith.constant 0 : i32
    %c0_i32_1 = arith.constant 0 : i32
    return %c0_i32, %c0_i32_0 : i32, i32
  }
  func.func @transform_8(%arg0: i32) -> (i32, i32) {
    %c0_i32 = arith.constant 0 : i32
    %c0_i32_0 = arith.constant 0 : i32
    %c0_i32_1 = arith.constant 0 : i32
    return %c0_i32, %c0_i32_0 : i32, i32
  }
  func.func @transform_9(%arg0: i32) -> (i32, i32) {
    %c0_i32 = arith.constant 0 : i32
    %c0_i32_0 = arith.constant 0 : i32
    %c0_i32_1 = arith.constant 0 : i32
    return %c0_i32, %c0_i32_0 : i32, i32
  }
  func.func @transform_10(%arg0: i32) -> (i32, i32) {
    %c0_i32 = arith.constant 0 : i32
    %c0_i32_0 = arith.constant 0 : i32
    %c0_i32_1 = arith.constant 0 : i32
    return %c0_i32, %c0_i32_0 : i32, i32
  }
  func.func @transform_11(%arg0: i32) -> (i32, i32) {
    %c0_i32 = arith.constant 0 : i32
    %c0_i32_0 = arith.constant 0 : i32
    return %arg0, %c0_i32 : i32, i32
  }
}

</mosaic_0001>

<bundles_post_ra>
// kernel: _lambda_.1
= control target key start
LH: loop header
LB: loop body
LE: loop exit
PB: predicated region body
PF: predicated region fallthrough
CT: control target
= control target key end

     0   :  { %vm110_vm0 = vcmask 130048   ;;  %v1373_v50 = vmov 0   ;;  %vm648_vm1 = vcmask 1041409   ;;  %vm650_vm2 = vcmask 1042434   ;;  %s1737_s2 = inlined_call_operand.vmem [shape: bf16[16,128], index: 2, kind: input, shape index: {}]   ;;  %s1738_s4 = inlined_call_operand.vmem [shape: bf16[16,128], index: 4, kind: input, shape index: {}]   ;;  %s1739_s0 = inlined_call_operand.vmem [shape: bf16[128,16], index: 0, kind: input, shape index: {}]   ;;  %s1740_s1 = inlined_call_operand.vmem [shape: bf16[128,16], index: 1, kind: input, shape index: {}]   ;;  %s1741_s7 = inlined_call_operand.vmem [shape: bf16[128,256], index: 7, kind: input, shape index: {}]   ;;  %s1742_s6 = inlined_call_operand.vmem [shape: bf16[128,256], index: 6, kind: input, shape index: {}]   ;;  %s1743_s9 = inlined_call_operand.vmem [shape: bf16[256,128], index: 9, kind: input, shape index: {}]   ;;  %s1744_s3 = inlined_call_operand.vmem [shape: f32[1,128], index: 3, kind: input, shape index: {}]   ;;  %s1745_s5 = inlined_call_operand.vmem [shape: f32[1,128], index: 5, kind: input, shape index: {}]   ;;  %s1746_s8 = inlined_call_operand.vmem [shape: f32[1,256], index: 8, kind: input, shape index: {}]   ;;  %s1747_s10 = inlined_call_operand.vmem [shape: f32[1,128], index: 10, kind: input, shape index: {}]   ;;  %s1748_s11 = inlined_call_operand.vmem [shape: f32[8,128], index: 11, kind: output, shape index: {}]  }
   0x1   :  { %v1291_v0 = vld [vmem:[%s1737_s2] sm:$0xff]   ;;  %v1295_v4 = vld [vmem:[%s1739_s0 + $0x8] sm:$0xff]   ;;  %v1297_v6 = vld [vmem:[%s1739_s0 + $0x10] sm:$0xff]   ;;  %vm652_vm3 = vcmask 1043459   ;;  %vm654_vm4 = vcmask 1044484   ;;  %vm656_vm5 = vcmask 1045509  }
   0x2   :  { %v1292_v1 = vld [vmem:[%s1738_s4] sm:$0xff]   ;;  %1254 = vmatprep.subr.bf16.mxu0 %v1291_v0  ;;  %v1296_v5 = vld [vmem:[%s1740_s1 + $0x8] sm:$0xff]   ;;  %v1298_v7 = vld [vmem:[%s1740_s1 + $0x10] sm:$0xff]   ;;  %vm658_vm6 = vcmask 1046534   ;;  %vm660_vm7 = vcmask 1047559  }
   0x3   :  { %v1293_v2 = vld [vmem:[%s1739_s0] sm:$0xff]   ;;  %1272 = vmatprep.subr.bf16.mxu1 %v1292_v1  ;;  %1255 = vmatpush3.bf16.msra.mxu0 %v1291_v0  ;;  %v1299_v8 = vld [vmem:[%s1739_s0 + $0x18] sm:$0xff]   ;;  %v1303_v12 = vld [vmem:[%s1739_s0 + $0x28] sm:$0xff]  }
   0x4   :  { %v1294_v3 = vld [vmem:[%s1740_s1] sm:$0xff]   ;;  %1273 = vmatpush3.bf16.msra.mxu1 %v1292_v1  ;;  %1256 = vmatprep.mubr.msk.bf16.mxu0 %vm110_vm0, %v1293_v2  ;;  %v1300_v9 = vld [vmem:[%s1740_s1 + $0x18] sm:$0xff]   ;;  %v1304_v13 = vld [vmem:[%s1740_s1 + $0x28] sm:$0xff]  }
   0x5   :  { %1274 = vmatprep.mubr.msk.bf16.mxu1 %vm110_vm0, %v1294_v3  ;;  %v1301_v10 = vld [vmem:[%s1739_s0 + $0x20] sm:$0xff]   ;;  %v1305_v14 = vld [vmem:[%s1739_s0 + $0x30] sm:$0xff]   ;;  %v1307_v16 = vld [vmem:[%s1739_s0 + $0x38] sm:$0xff]  }
   0x6   :  { %1257 = vmatmul.mubr.msk.bf16.vlgmr.msra.gmra.mxu0 %vm110_vm0, %v1295_v4  ;;  %v1302_v11 = vld [vmem:[%s1740_s1 + $0x20] sm:$0xff]   ;;  %v1306_v15 = vld [vmem:[%s1740_s1 + $0x30] sm:$0xff]   ;;  %v1308_v17 = vld [vmem:[%s1740_s1 + $0x38] sm:$0xff]  }
   0x7   :  { %1275 = vmatmul.mubr.msk.bf16.vlgmr.msra.gmra.mxu1 %vm110_vm0, %v1296_v5  ;;  %1260 = vmatprep.mubr.msk.bf16.mxu0 %vm110_vm0, %v1297_v6  ;;  %v1311_v18 = vld [vmem:[%s1741_s7 + $0x74] ss:$8 sps:$4 sm:$0xff]   ;;  %v1309_v19 = vld [vmem:[%s1741_s7 + $0x70] ss:$8 sps:$4 sm:$0xff]   ;;  %v1317_v22 = vld [vmem:[%s1741_s7 + $0x64] ss:$8 sps:$4 sm:$0xff]  }
   0x8   :  { %1278 = vmatprep.mubr.msk.bf16.mxu1 %vm110_vm0, %v1298_v7  ;;  %744 = vmatprep.subr.bf16.mxu0 %v1311_v18  ;;  %v1312_v20 = vld [vmem:[%s1742_s6 + $0x70] ss:$8 sps:$4 sm:$0xff]   ;;  %v1314_v21 = vld [vmem:[%s1742_s6 + $0x74] ss:$8 sps:$4 sm:$0xff]   ;;  %v1320_v23 = vld [vmem:[%s1742_s6 + $0x64] ss:$8 sps:$4 sm:$0xff]  }
   0x9   :  { %745 = vmatpush1.bf16.msra.mxu0 %v1309_v19  ;;  %890 = vmatprep.subr.bf16.mxu1 %v1314_v21  ;;  %v1315_v24 = vld [vmem:[%s1741_s7 + $0x60] ss:$8 sps:$4 sm:$0xff]   ;;  %v1323_v26 = vld [vmem:[%s1741_s7 + $0x54] ss:$8 sps:$4 sm:$0xff]   ;;  %v1321_v28 = vld [vmem:[%s1741_s7 + $0x50] ss:$8 sps:$4 sm:$0xff]  }
   0xa   :  { %891 = vmatpush1.bf16.msra.mxu1 %v1312_v20  ;;  %v1318_v25 = vld [vmem:[%s1742_s6 + $0x60] ss:$8 sps:$4 sm:$0xff]   ;;  %746 = vmatprep.subr.bf16.mxu0 %v1317_v22  ;;  %v1326_v27 = vld [vmem:[%s1742_s6 + $0x54] ss:$8 sps:$4 sm:$0xff]   ;;  %v1324_v29 = vld [vmem:[%s1742_s6 + $0x50] ss:$8 sps:$4 sm:$0xff]  }
   0xb   :  { %892 = vmatprep.subr.bf16.mxu1 %v1320_v23  ;;  %v1329_v30 = vld [vmem:[%s1741_s7 + $0x44] ss:$8 sps:$4 sm:$0xff]   ;;  %v1327_v32 = vld [vmem:[%s1741_s7 + $0x40] ss:$8 sps:$4 sm:$0xff]   ;;  %v1335_v34 = vld [vmem:[%s1741_s7 + $0x34] ss:$8 sps:$4 sm:$0xff]  }
   0xc   :  { %v1332_v31 = vld [vmem:[%s1742_s6 + $0x44] ss:$8 sps:$4 sm:$0xff]   ;;  %v1330_v33 = vld [vmem:[%s1742_s6 + $0x40] ss:$8 sps:$4 sm:$0xff]   ;;  %v1338_v35 = vld [vmem:[%s1742_s6 + $0x34] ss:$8 sps:$4 sm:$0xff]  }
   0xd   :  { %747 = vmatpush1.bf16.msra.mxu0 %v1315_v24  ;;  %v1333_v36 = vld [vmem:[%s1741_s7 + $0x30] ss:$8 sps:$4 sm:$0xff]   ;;  %v1341_v38 = vld [vmem:[%s1741_s7 + $0x24] ss:$8 sps:$4 sm:$0xff]   ;;  %v1339_v40 = vld [vmem:[%s1741_s7 + $0x20] ss:$8 sps:$4 sm:$0xff]  }
   0xe   :  { %1261 = vmatmul.mubr.msk.bf16.gmra.mxu0 %vm110_vm0, %v1299_v8  ;;  %893 = vmatpush1.bf16.msra.mxu1 %v1318_v25  ;;  %v1336_v37 = vld [vmem:[%s1742_s6 + $0x30] ss:$8 sps:$4 sm:$0xff]   ;;  %v1344_v39 = vld [vmem:[%s1742_s6 + $0x24] ss:$8 sps:$4 sm:$0xff]   ;;  %v1342_v41 = vld [vmem:[%s1742_s6 + $0x20] ss:$8 sps:$4 sm:$0xff]  }
   0xf   :  { %1279 = vmatmul.mubr.msk.bf16.gmra.mxu1 %vm110_vm0, %v1300_v9  ;;  %1264 = vmatprep.mubr.msk.bf16.mxu0 %vm110_vm0, %v1301_v10  ;;  %v1347_v42 = vld [vmem:[%s1741_s7 + $0x14] ss:$8 sps:$4 sm:$0xff]   ;;  %v1345_v44 = vld [vmem:[%s1741_s7 + $0x10] ss:$8 sps:$4 sm:$0xff]   ;;  %v1351_v46 = vld [vmem:[%s1741_s7] ss:$8 sps:$4 sm:$0xff]  }
  0x10   :  { %1282 = vmatprep.mubr.msk.bf16.mxu1 %vm110_vm0, %v1302_v11  ;;  %748 = vmatprep.subr.bf16.mxu0 %v1323_v26  ;;  %v1350_v43 = vld [vmem:[%s1742_s6 + $0x14] ss:$8 sps:$4 sm:$0xff]   ;;  %v1348_v45 = vld [vmem:[%s1742_s6 + $0x10] ss:$8 sps:$4 sm:$0xff]   ;;  %v1353_v47 = vld [vmem:[%s1741_s7 + $0x4] ss:$8 sps:$4 sm:$0xff]  }
  0x11   :  { %894 = vmatprep.subr.bf16.mxu1 %v1326_v27  ;;  %749 = vmatpush1.bf16.msra.mxu0 %v1321_v28  ;;  %v1354_v48 = vld [vmem:[%s1742_s6] ss:$8 sps:$4 sm:$0xff]   ;;  %v1356_v49 = vld [vmem:[%s1742_s6 + $0x4] ss:$8 sps:$4 sm:$0xff]   ;;  %v1357_v51 = vld [vmem:[%s1743_s9 + $0x78] sm:$0xff]  }
  0x12   :  { %895 = vmatpush1.bf16.msra.mxu1 %v1324_v29  ;;  %750 = vmatprep.subr.bf16.mxu0 %v1329_v30  ;;  %v1606_v53 = vld [vmem:[%s1744_s3] ss:$0 sm:$0xff] }
  0x13   :  { %896 = vmatprep.subr.bf16.mxu1 %v1332_v31  ;;  %v1611_v55 = vld [vmem:[%s1745_s5] ss:$0 sm:$0xff] }
  0x15   :  { %751 = vmatpush1.bf16.msra.mxu0 %v1327_v32 }
  0x16   :  { %1265 = vmatmul.mubr.msk.bf16.gmra.mxu0 %vm110_vm0, %v1303_v12  ;;  %897 = vmatpush1.bf16.msra.mxu1 %v1330_v33 }
  0x17   :  { %1283 = vmatmul.mubr.msk.bf16.gmra.mxu1 %vm110_vm0, %v1304_v13  ;;  %1268 = vmatprep.mubr.msk.bf16.mxu0 %vm110_vm0, %v1305_v14 }
  0x18   :  { %1286 = vmatprep.mubr.msk.bf16.mxu1 %vm110_vm0, %v1306_v15  ;;  %752 = vmatprep.subr.bf16.mxu0 %v1335_v34 }
  0x19   :  { %898 = vmatprep.subr.bf16.mxu1 %v1338_v35  ;;  %753 = vmatpush1.bf16.msra.mxu0 %v1333_v36 }
  0x1a   :  { %899 = vmatpush1.bf16.msra.mxu1 %v1336_v37  ;;  %754 = vmatprep.subr.bf16.mxu0 %v1341_v38 }
  0x1b   :  { %900 = vmatprep.subr.bf16.mxu1 %v1344_v39 }
  0x1d   :  { %755 = vmatpush1.bf16.msra.mxu0 %v1339_v40 }
  0x1e   :  { %1269 = vmatmul.mubr.msk.bf16.gmra.mxu0 %vm110_vm0, %v1307_v16  ;;  %901 = vmatpush1.bf16.msra.mxu1 %v1342_v41 }
  0x1f   :  { %1287 = vmatmul.mubr.msk.bf16.gmra.mxu1 %vm110_vm0, %v1308_v17  ;;  %756 = vmatprep.subr.bf16.mxu0 %v1347_v42 }
  0x20   :  { %902 = vmatprep.subr.bf16.mxu1 %v1350_v43  ;;  %776 = vmatprep.mubr.bf16.mxu0 %v1373_v50 }
  0x21   :  { %757 = vmatpush1.bf16.msra.mxu0 %v1345_v44  ;;  %922 = vmatprep.mubr.bf16.mxu1 %v1373_v50 }
  0x22   :  { %903 = vmatpush1.bf16.msra.mxu1 %v1348_v45  ;;  %758 = vmatprep.subr.bf16.mxu0 %v1353_v47 }
  0x23   :  { %904 = vmatprep.subr.bf16.mxu1 %v1356_v49 }
  0x25   :  { %759 = vmatpush1.bf16.msra.mxu0 %v1351_v46 }
  0x26   :  { %905 = vmatpush1.bf16.msra.mxu1 %v1354_v48  ;;  %1232 = vmatprep.subr.bf16.mxu0 %v1357_v51 }
  0xc6   :  { %v1258_v52 = vpop.f32.mrf.mxu0 }
  0xc7   :  { %v1276_v54 = vpop.f32.mrf.mxu1  ;;  %v178_v57 = vadd.f32 %v1258_v52, %v1606_v53 }
  0xc8   :  { %v169_v56 = vpop.f32.mrf.mxu0  ;;  %v458_v59 = vadd.f32 %v1276_v54, %v1611_v55 }
  0xc9   :  { %v449_v58 = vpop.f32.mrf.mxu1  ;;  %v170_v61 = vadd.f32 %v1606_v53, %v169_v56  ;;  %v234_v3 = vmax.f32 %v178_v57, 0.0 }
  0xca   :  { %v1259_v60 = vpop.f32.mrf.mxu0  ;;  %v450_v0 = vadd.f32 %v1611_v55, %v449_v58  ;;  %v514_v7 = vmax.f32 %v458_v59, 0.0 }
  0xcb   :  { %v181_v62 = vadd.f32 %v1259_v60, %v1606_v53  ;;  %v1277_v63 = vpop.f32.mrf.mxu1  ;;  %v232_v11 = vmax.f32 %v170_v61, 0.0 }
  0xcc   :  { %v461_v1 = vadd.f32 %v1277_v63, %v1611_v55  ;;  %v172_v2 = vpop.f32.mrf.mxu0  ;;  %v512_v16 = vmax.f32 %v450_v0, 0.0 }
  0xcd   :  { %v235_v4 = vmax.f32 %v181_v62, 0.0  ;;  %v173_v5 = vadd.f32 %v1606_v53, %v172_v2  ;;  %v452_v6 = vpop.f32.mrf.mxu1 }
  0xce   :  { %v515_v8 = vmax.f32 %v461_v1, 0.0  ;;  %v453_v9 = vadd.f32 %v1611_v55, %v452_v6  ;;  %v1262_v10 = vpop.f32.mrf.mxu0 }
  0xcf   :  { %v255_v12 = vadd.f32 %v235_v4, %v234_v3  ;;  %v233_v13 = vmax.f32 %v173_v5, 0.0  ;;  %v194_v14 = vadd.f32 %v1262_v10, %v1606_v53  ;;  %v1280_v15 = vpop.f32.mrf.mxu1 }
  0xd0   :  { %v535_v17 = vadd.f32 %v515_v8, %v514_v7  ;;  %v513_v18 = vmax.f32 %v453_v9, 0.0  ;;  %v474_v19 = vadd.f32 %v1280_v15, %v1611_v55  ;;  %v185_v20 = vpop.f32.mrf.mxu0 }
  0xd1   :  { %v256_v21 = vrot.slane %v255_v12, 4  ;;  %v248_v22 = vadd.f32 %v233_v13, %v232_v11  ;;  %v238_v23 = vmax.f32 %v194_v14, 0.0  ;;  %v186_v24 = vadd.f32 %v1606_v53, %v185_v20  ;;  %v465_v25 = vpop.f32.mrf.mxu1 }
  0xd2   :  { %v536_v26 = vrot.slane %v535_v17, 4  ;;  %v528_v27 = vadd.f32 %v513_v18, %v512_v16  ;;  %v518_v28 = vmax.f32 %v474_v19, 0.0  ;;  %v466_v29 = vadd.f32 %v1611_v55, %v465_v25  ;;  %v1263_v30 = vpop.f32.mrf.mxu0 }
  0xd3   :  { %v257_v31 = vadd.f32 %v256_v21, %v255_v12  ;;  %v249_v32 = vrot.slane %v248_v22, 4  ;;  %v236_v33 = vmax.f32 %v186_v24, 0.0  ;;  %v197_v34 = vadd.f32 %v1263_v30, %v1606_v53  ;;  %v1281_v35 = vpop.f32.mrf.mxu1 }
  0xd4   :  { %v537_v36 = vadd.f32 %v536_v26, %v535_v17  ;;  %v529_v37 = vrot.slane %v528_v27, 4  ;;  %v516_v38 = vmax.f32 %v466_v29, 0.0  ;;  %v477_v39 = vadd.f32 %v1281_v35, %v1611_v55  ;;  %v188_v40 = vpop.f32.mrf.mxu0 }
  0xd5   :  { %v258_v41 = vrot.slane %v257_v31, 2  ;;  %v250_v42 = vadd.f32 %v249_v32, %v248_v22  ;;  %v239_v43 = vmax.f32 %v197_v34, 0.0  ;;  %v189_v44 = vadd.f32 %v1606_v53, %v188_v40  ;;  %v468_v45 = vpop.f32.mrf.mxu1 }
  0xd6   :  { %v538_v46 = vrot.slane %v537_v36, 2  ;;  %v530_v47 = vadd.f32 %v529_v37, %v528_v27  ;;  %v519_v48 = vmax.f32 %v477_v39, 0.0  ;;  %v469_v49 = vadd.f32 %v1611_v55, %v468_v45  ;;  %v1266_v50 = vpop.f32.mrf.mxu0 }
  0xd7   :  { %v259_v51 = vadd.f32 %v258_v41, %v257_v31  ;;  %v251_v52 = vrot.slane %v250_v42, 2  ;;  %v269_v54 = vadd.f32 %v239_v43, %v238_v23  ;;  %v237_v56 = vmax.f32 %v189_v44, 0.0  ;;  %v1284_v57 = vpop.f32.mrf.mxu1 }
  0xd8   :  { %v539_v58 = vadd.f32 %v538_v46, %v537_v36  ;;  %v531_v59 = vrot.slane %v530_v47, 2  ;;  %v549_v60 = vadd.f32 %v519_v48, %v518_v28  ;;  %v517_v61 = vmax.f32 %v469_v49, 0.0  ;;  %v201_v2 = vpop.f32.mrf.mxu0 }
  0xd9   :  { %v260_v62 = vrot.slane %v259_v51, 1  ;;  %v252_v63 = vadd.f32 %v251_v52, %v250_v42  ;;  %v270_v0 = vrot.slane %v269_v54, 4  ;;  %v262_v1 = vadd.f32 %v237_v56, %v236_v33  ;;  %v481_v3 = vpop.f32.mrf.mxu1 }
  0xda   :  { %v540_v4 = vrot.slane %v539_v58, 1  ;;  %v532_v5 = vadd.f32 %v531_v59, %v530_v47  ;;  %v550_v6 = vrot.slane %v549_v60, 4  ;;  %v542_v7 = vadd.f32 %v517_v61, %v516_v38  ;;  %v1267_v19 = vpop.f32.mrf.mxu0 }
  0xdb   :  { %v261_v8 = vadd.f32 %v260_v62, %v259_v51  ;;  %v253_v9 = vrot.slane %v252_v63, 1  ;;  %v271_v10 = vadd.f32 %v270_v0, %v269_v54  ;;  %v263_v11 = vrot.slane %v262_v1, 4  ;;  %v1285_v20 = vpop.f32.mrf.mxu1 }
  0xdc   :  { %v541_v12 = vadd.f32 %v540_v4, %v539_v58  ;;  %v533_v13 = vrot.slane %v532_v5, 1  ;;  %v551_v14 = vadd.f32 %v550_v6, %v549_v60  ;;  %v543_v15 = vrot.slane %v542_v7, 4  ;;  %v204_v32 = vpop.f32.mrf.mxu0 }
  0xdd   :  { %v254_v16 = vadd.f32 %v253_v9, %v252_v63  ;;  %v272_v17 = vrot.slane %v271_v10, 2  ;;  %v264_v18 = vadd.f32 %v263_v11, %v262_v1  ;;  %v305_v24 = vmul.f32 0.0625, %v261_v8  ;;  %v484_v33 = vpop.f32.mrf.mxu1 }
  0xde   :  { %v534_v21 = vadd.f32 %v533_v13, %v532_v5  ;;  %v552_v22 = vrot.slane %v551_v14, 2  ;;  %v544_v23 = vadd.f32 %v543_v15, %v542_v7  ;;  %v585_v25 = vmul.f32 0.0625, %v541_v12  ;;  %v1270_v42 = vpop.f32.mrf.mxu0 }
  0xdf   :  { %v265_v26 = vrot.slane %v264_v18, 2  ;;  %v304_v27 = vmul.f32 0.0625, %v254_v16  ;;  %v273_v28 = vadd.f32 %v272_v17, %v271_v10  ;;  %v313_v34 = vpack.c.bf16 %v305_v24, %v305_v24  ;;  %v1288_v43 = vpop.f32.mrf.mxu1 }
  0xe0   :  { %v545_v29 = vrot.slane %v544_v23, 2  ;;  %v584_v30 = vmul.f32 0.0625, %v534_v21  ;;  %v553_v31 = vadd.f32 %v552_v22, %v551_v14  ;;  %v593_v35 = vpack.c.bf16 %v585_v25, %v585_v25  ;;  %v217_v60 = vpop.f32.mrf.mxu0 }
  0xe1   :  { %v266_v36 = vadd.f32 %v265_v26, %v264_v18  ;;  %v312_v38 = vpack.c.bf16 %v304_v27, %v304_v27  ;;  %v274_v39 = vrot.slane %v273_v28, 1  ;;  %v210_v44 = vadd.f32 %v1266_v50, %v1606_v53  ;;  %v497_v61 = vpop.f32.mrf.mxu1 }
  0xe2   :  { %v546_v37 = vadd.f32 %v545_v29, %v544_v23  ;;  %v592_v40 = vpack.c.bf16 %v584_v30, %v584_v30  ;;  %v554_v41 = vrot.slane %v553_v31, 1  ;;  %v490_v45 = vadd.f32 %v1284_v57, %v1611_v55  ;;  %v1271_v14 = vpop.f32.mrf.mxu0 }
  0xe3   :  { %v1631_v46 = vunpack.c.l.b16 %v313_v34  ;;  %v1633_v47 = vunpack.c.l.b16 %v593_v35  ;;  %v267_v48 = vrot.slane %v266_v36, 1  ;;  %v1635_v51 = vunpack.c.l.b16 %v312_v38  ;;  %v1289_v15 = vpop.f32.mrf.mxu1 }
  0xe4   :  { %v547_v49 = vrot.slane %v546_v37, 1  ;;  %v275_v52 = vadd.f32 %v274_v39, %v273_v28  ;;  %v213_v54 = vadd.f32 %v1267_v19, %v1606_v53  ;;  %v493_v56 = vadd.f32 %v1285_v20, %v1611_v55 }
  0xe5   :  { %v1639_v58 = vunpack.c.l.b16 %v592_v40  ;;  %v555_v59 = vadd.f32 %v554_v41, %v553_v31  ;;  %v202_v50 = vadd.f32 %v1606_v53, %v201_v2  ;;  %v482_v57 = vadd.f32 %v1611_v55, %v481_v3 }
  0xe6   :  { %v242_v62 = vmax.f32 %v210_v44, 0.0  ;;  %v522_v63 = vmax.f32 %v490_v45, 0.0  ;;  %v243_v0 = vmax.f32 %v213_v54, 0.0  ;;  %v523_v1 = vmax.f32 %v493_v56, 0.0 }
  0xe7   :  { %v268_v4 = vadd.f32 %v267_v48, %v266_v36  ;;  %v548_v5 = vadd.f32 %v547_v49, %v546_v37  ;;  %v205_v6 = vadd.f32 %v1606_v53, %v204_v32  ;;  %v485_v7 = vadd.f32 %v1611_v55, %v484_v33  ;;  %v220_v32 = vpop.f32.mrf.mxu0  ;;  %v500_v33 = vpop.f32.mrf.mxu1 }
  0xe8   :  { %v283_v8 = vadd.f32 %v243_v0, %v242_v62  ;;  %v563_v9 = vadd.f32 %v523_v1, %v522_v63  ;;  %v226_v10 = vadd.f32 %v1270_v42, %v1606_v53  ;;  %v506_v2 = vadd.f32 %v1288_v43, %v1611_v55 }
  0xe9   :  { %v240_v11 = vmax.f32 %v202_v50, 0.0  ;;  %v520_v3 = vmax.f32 %v482_v57, 0.0  ;;  %v241_v12 = vmax.f32 %v205_v6, 0.0  ;;  %v521_v13 = vmax.f32 %v485_v7, 0.0 }
  0xea   :  { %v1647_v16 = vmul.f32 0.0625, %v275_v52  ;;  %v1649_v17 = vmul.f32 0.0625, %v555_v59  ;;  %v284_v18 = vrot.slane %v283_v8, 4  ;;  %v564_v19 = vrot.slane %v563_v9, 4 }
  0xeb   :  { %v1651_v20 = vmul.f32 0.0625, %v268_v4  ;;  %v1653_v21 = vmul.f32 0.0625, %v548_v5  ;;  %v276_v22 = vadd.f32 %v241_v12, %v240_v11  ;;  %v556_v23 = vadd.f32 %v521_v13, %v520_v3 }
  0xec   :  { %v285_v24 = vadd.f32 %v284_v18, %v283_v8  ;;  %v565_v25 = vadd.f32 %v564_v19, %v563_v9  ;;  %v246_v26 = vmax.f32 %v226_v10, 0.0  ;;  %v526_v27 = vmax.f32 %v506_v2, 0.0 }
  0xed   :  { %v277_v28 = vrot.slane %v276_v22, 4  ;;  %v557_v29 = vrot.slane %v556_v23, 4  ;;  %v229_v30 = vadd.f32 %v1271_v14, %v1606_v53  ;;  %v509_v31 = vadd.f32 %v1289_v15, %v1611_v55 }
  0xee   :  { %v286_v34 = vrot.slane %v285_v24, 2  ;;  %v566_v35 = vrot.slane %v565_v25, 2  ;;  %v218_v36 = vadd.f32 %v1606_v53, %v217_v60  ;;  %v498_v37 = vadd.f32 %v1611_v55, %v497_v61 }
  0xef   :  { %v278_v38 = vadd.f32 %v277_v28, %v276_v22  ;;  %v558_v39 = vadd.f32 %v557_v29, %v556_v23  ;;  %v247_v40 = vmax.f32 %v229_v30, 0.0  ;;  %v527_v41 = vmax.f32 %v509_v31, 0.0 }
  0xf0   :  { %v287_v42 = vadd.f32 %v286_v34, %v285_v24  ;;  %v567_v43 = vadd.f32 %v566_v35, %v565_v25  ;;  %v221_v44 = vadd.f32 %v1606_v53, %v220_v32  ;;  %v501_v45 = vadd.f32 %v1611_v55, %v500_v33 }
  0xf1   :  { %v279_v48 = vrot.slane %v278_v38, 2  ;;  %v559_v49 = vrot.slane %v558_v39, 2  ;;  %v297_v52 = vadd.f32 %v247_v40, %v246_v26  ;;  %v577_v54 = vadd.f32 %v527_v41, %v526_v27 }
  0xf2   :  { %v244_v56 = vmax.f32 %v218_v36, 0.0  ;;  %v524_v59 = vmax.f32 %v498_v37, 0.0  ;;  %v245_v50 = vmax.f32 %v221_v44, 0.0  ;;  %v525_v57 = vmax.f32 %v501_v45, 0.0 }
  0xf3   :  { %v280_v60 = vadd.f32 %v279_v48, %v278_v38  ;;  %v560_v61 = vadd.f32 %v559_v49, %v558_v39  ;;  %v298_v62 = vrot.slane %v297_v52, 4  ;;  %v578_v63 = vrot.slane %v577_v54, 4 }
  0xf4   :  { %v288_v0 = vrot.slane %v287_v42, 1  ;;  %v568_v1 = vrot.slane %v567_v43, 1  ;;  %v290_v4 = vadd.f32 %v245_v50, %v244_v56  ;;  %v570_v53 = vadd.f32 %v525_v57, %v524_v59 }
  0xf5   :  { %v281_v5 = vrot.slane %v280_v60, 1  ;;  %v561_v55 = vrot.slane %v560_v61, 1  ;;  %v299_v6 = vadd.f32 %v298_v62, %v297_v52  ;;  %v579_v7 = vadd.f32 %v578_v63, %v577_v54 }
  0xf6   :  { %v314_v8 = vpack.c.bf16 %v1651_v20, %v1651_v20  ;;  %v594_v9 = vpack.c.bf16 %v1653_v21, %v1653_v21  ;;  %v291_v10 = vrot.slane %v290_v4, 4  ;;  %v571_v2 = vrot.slane %v570_v53, 4 }
  0xf7   :  { %v282_v11 = vadd.f32 %v281_v5, %v280_v60  ;;  %v562_v3 = vadd.f32 %v561_v55, %v560_v61  ;;  %v300_v12 = vrot.slane %v299_v6, 2  ;;  %v580_v13 = vrot.slane %v579_v7, 2 }
  0xf8   :  { %v289_v14 = vadd.f32 %v288_v0, %v287_v42  ;;  %v569_v15 = vadd.f32 %v568_v1, %v567_v43  ;;  %v292_v18 = vadd.f32 %v291_v10, %v290_v4  ;;  %v572_v19 = vadd.f32 %v571_v2, %v570_v53 }
  0xf9   :  { %v308_v22 = vmul.f32 0.0625, %v282_v11  ;;  %v588_v23 = vmul.f32 0.0625, %v562_v3  ;;  %v301_v24 = vadd.f32 %v300_v12, %v299_v6  ;;  %v581_v25 = vadd.f32 %v580_v13, %v579_v7  ;;  %v1358_v12 = vld [vmem:[%s1743_s9 + $0x38] sm:$0xff]  }
  0xfa   :  { %v315_v20 = vpack.c.bf16 %v1647_v16, %v1647_v16  ;;  %v595_v21 = vpack.c.bf16 %v1649_v17, %v1649_v17  ;;  %v293_v26 = vrot.slane %v292_v18, 2  ;;  %v573_v27 = vrot.slane %v572_v19, 2 }
  0xfb   :  { %v795_v28 = vunpack.c.l.b16 %v314_v8  ;;  %v642_v29 = vunpack.c.l.b16 %v594_v9  ;;  %v302_v30 = vrot.slane %v301_v24, 1  ;;  %v582_v31 = vrot.slane %v581_v25, 1 }
  0xfc   :  { %v316_v32 = vpack.c.bf16 %v308_v22, %v308_v22  ;;  %v596_v33 = vpack.c.bf16 %v588_v23, %v588_v23  ;;  %v294_v34 = vadd.f32 %v293_v26, %v292_v18  ;;  %v574_v35 = vadd.f32 %v573_v27, %v572_v19  ;;  %v1360_v18 = vld [vmem:[%s1743_s9 + $0x30] sm:$0xff]   ;;  %v1361_v19 = vld [vmem:[%s1743_s9 + $0x68] sm:$0xff]   ;;  %v1363_v23 = vld [vmem:[%s1743_s9 + $0x60] sm:$0xff]  }
  0xfd   :  { %v309_v36 = vmul.f32 0.0625, %v289_v14  ;;  %v589_v37 = vmul.f32 0.0625, %v569_v15  ;;  %v303_v38 = vadd.f32 %v302_v30, %v301_v24  ;;  %v583_v39 = vadd.f32 %v582_v31, %v581_v25  ;;  %v1359_v15 = vld [vmem:[%s1743_s9 + $0x70] sm:$0xff]   ;;  %v1362_v22 = vld [vmem:[%s1743_s9 + $0x28] sm:$0xff]   ;;  %v1364_v24 = vld [vmem:[%s1743_s9 + $0x20] sm:$0xff]  }
  0xfe   :  { %v801_v16 = vsel %vm648_vm1, %v1631_v46, %v1635_v51  ;;  %v649_v17 = vsel %vm648_vm1, %v1633_v47, %v1639_v58  ;;  %v295_v40 = vrot.slane %v294_v34, 1  ;;  %v575_v41 = vrot.slane %v574_v35, 1  ;;  %v1365_v25 = vld [vmem:[%s1743_s9 + $0x58] sm:$0xff]   ;;  %v1368_v26 = vld [vmem:[%s1743_s9 + $0x10] sm:$0xff]   ;;  %v1369_v27 = vld [vmem:[%s1743_s9 + $0x48] sm:$0xff]  }
  0xff   :  { %v802_v42 = vsel %vm650_vm2, %v795_v28, %v801_v16  ;;  %v651_v43 = vsel %vm650_vm2, %v642_v29, %v649_v17  ;;  %v311_v44 = vmul.f32 0.0625, %v303_v38  ;;  %v591_v45 = vmul.f32 0.0625, %v583_v39  ;;  %v1370_v28 = vld [vmem:[%s1743_s9 + $0x8] sm:$0xff]   ;;  %v1371_v29 = vld [vmem:[%s1743_s9 + $0x40] sm:$0xff]  }
 0x100   :  { %v797_v48 = vunpack.c.l.b16 %v316_v32  ;;  %v644_v49 = vunpack.c.l.b16 %v596_v33  ;;  %v296_v52 = vadd.f32 %v295_v40, %v294_v34  ;;  %v576_v54 = vadd.f32 %v575_v41, %v574_v35  ;;  %v1372_v30 = vld [vmem:[%s1743_s9] sm:$0xff]  }
 0x101   :  { %v796_v56 = vunpack.c.l.b16 %v315_v20  ;;  %v643_v59 = vunpack.c.l.b16 %v595_v21  ;;  %v317_v50 = vpack.c.bf16 %v309_v36, %v309_v36  ;;  %v597_v46 = vpack.c.bf16 %v589_v37, %v589_v37  ;;  %v1366_v20 = vld [vmem:[%s1743_s9 + $0x18] sm:$0xff]   ;;  %v1367_v21 = vld [vmem:[%s1743_s9 + $0x50] sm:$0xff]   ;;  %v931_v34 = vld [vmem:[%s1746_s8] sm:$0x3] }
 0x102   :  { %v310_v51 = vmul.f32 0.0625, %v296_v52  ;;  %v590_v57 = vmul.f32 0.0625, %v576_v54  ;;  %v319_v60 = vpack.c.bf16 %v311_v44, %v311_v44  ;;  %v599_v61 = vpack.c.bf16 %v591_v45, %v591_v45 }
 0x103   :  { %v803_v47 = vsel %vm652_vm3, %v796_v56, %v802_v42  ;;  %v653_v58 = vsel %vm652_vm3, %v643_v59, %v651_v43  ;;  %v798_v4 = vunpack.c.l.b16 %v317_v50  ;;  %v645_v53 = vunpack.c.l.b16 %v597_v46  ;;  %v1197_v46 = vld [vmem:[%s1747_s10] ss:$0 sm:$0xff] }
 0x104   :  { %v804_v62 = vsel %vm654_vm4, %v797_v48, %v803_v47  ;;  %v655_v63 = vsel %vm654_vm4, %v644_v49, %v653_v58  ;;  %v318_v0 = vpack.c.bf16 %v310_v51, %v310_v51  ;;  %v598_v1 = vpack.c.bf16 %v590_v57, %v590_v57 }
 0x105   :  { %v800_v6 = vunpack.c.l.b16 %v319_v60  ;;  %v647_v7 = vunpack.c.l.b16 %v599_v61  ;;  %v657_v8 = vsel %vm656_vm5, %v645_v53, %v655_v63  ;;  %v805_v9 = vsel %vm656_vm5, %v798_v4, %v804_v62 }
 0x106   :  { %v799_v5 = vunpack.c.l.b16 %v318_v0  ;;  %v646_v55 = vunpack.c.l.b16 %v598_v1  ;;  %v933_v31 = vlaneseq }
 0x108   :  { %v659_v10 = vsel %vm658_vm6, %v646_v55, %v657_v8  ;;  %v806_v2 = vsel %vm658_vm6, %v799_v5, %v805_v9  ;;  %v934_v32 = vshrl.u32 %v933_v31, 7 }
 0x109   :  { %v661_v11 = vsel %vm660_vm7, %v647_v7, %v659_v10  ;;  %v807_v3 = vsel %vm660_vm7, %v800_v6, %v806_v2 }
 0x10a   :  { %v662_v13 = vpack.c.b16 %v661_v11, %v661_v11  ;;  %v808_v14 = vpack.c.b16 %v807_v3, %v807_v3  ;;  %v935_v33 = vsub.s32 0, %v934_v32  ;;  %v939_v35 = vsub.s32 1, %v934_v32 }
 0x10c   :  { %777 = vmatmul.mubr.bf16.vlgmr.msra.gmra.mxu0 %v662_v13  ;;  %923 = vmatmul.mubr.bf16.vlgmr.msra.gmra.mxu1 %v808_v14  ;;  %v936_v36 = vrot.slane %v931_v34, %v935_v33  ;;  %v940_v16 = vrot.slane %v931_v34, %v939_v35 }
 0x10d   :  { %1233 = vmatpush3.bf16.msra.mxu0 %v1358_v12 }
 0x10e   :  { %1234 = vmatprep.subr.bf16.mxu0 %v1359_v15 }
 0x111   :  { %1235 = vmatpush3.bf16.msra.mxu0 %v1360_v18 }
 0x112   :  { %1236 = vmatprep.subr.bf16.mxu0 %v1361_v19 }
 0x115   :  { %1237 = vmatpush3.bf16.msra.mxu0 %v1362_v22 }
 0x116   :  { %1238 = vmatprep.subr.bf16.mxu0 %v1363_v23 }
 0x119   :  { %1239 = vmatpush3.bf16.msra.mxu0 %v1364_v24 }
 0x11a   :  { %1240 = vmatprep.subr.bf16.mxu0 %v1365_v25 }
 0x11d   :  { %1241 = vmatpush3.bf16.msra.mxu0 %v1366_v20 }
 0x11e   :  { %1242 = vmatprep.subr.bf16.mxu0 %v1367_v21 }
 0x121   :  { %1243 = vmatpush3.bf16.msra.mxu0 %v1368_v26 }
 0x122   :  { %1244 = vmatprep.subr.bf16.mxu0 %v1369_v27 }
 0x125   :  { %1245 = vmatpush3.bf16.msra.mxu0 %v1370_v28 }
 0x126   :  { %1246 = vmatprep.subr.bf16.mxu0 %v1371_v29 }
 0x129   :  { %1247 = vmatpush3.bf16.msra.mxu0 %v1372_v30 }
 0x1cc   :  { %v778_v37 = vpop.f32.mrf.mxu0  ;;  %v924_v38 = vpop.f32.mrf.mxu1 }
 0x1cd   :  { %v925_v39 = vadd.f32 %v924_v38, %v778_v37 }
 0x1ce   :  { %v780_v17 = vpop.f32.mrf.mxu0  ;;  %v926_v40 = vpop.f32.mrf.mxu1 }
 0x1cf   :  { %v943_v41 = vadd.f32 %v936_v36, %v925_v39  ;;  %v927_v42 = vadd.f32 %v926_v40, %v780_v17 }
 0x1d0   :  { %v782_v43 = vpop.f32.mrf.mxu0  ;;  %v928_v44 = vpop.f32.mrf.mxu1 }
 0x1d1   :  { %v944_v45 = vadd.f32 %v940_v16, %v927_v42  ;;  %v945_v48 = vmax.f32 %v943_v41, 0.0 }
 0x1d2   :  { %v783_v49 = vpop.f32.mrf.mxu0  ;;  %v929_v52 = vpop.f32.mrf.mxu1 }
 0x1d3   :  { %v946_v54 = vmax.f32 %v944_v45, 0.0  ;;  %v947_v59 = vpack.c.bf16 %v945_v48, %v945_v48 }
 0x1d5   :  { %v948_v56 = vpack.c.bf16 %v946_v54, %v946_v54 }
 0x1d7   :  { %1116 = vmatprep.mubr.bf16.mxu0 %v948_v56 }
 0x1d8   :  { %1117 = vmatmul.mubr.bf16.vlgmr.msra.gmra.mxu0 %v947_v59 }
 0x298   :  { %v1248_v50 = vpop.f32.mrf.mxu0 }
 0x29a   :  { %v1249_v51 = vpop.f32.mrf.mxu0 }
 0x29b   :  { %v1250_v57 = vadd.f32 %v1249_v51, %v1248_v50 }
 0x29c   :  { %v1251_v47 = vpop.f32.mrf.mxu0 }
 0x29d   :  { %v1119_v58 = vadd.f32 %v1250_v57, %v1197_v46 }
 0x29e   :  { %v1252_v60 = vpop.f32.mrf.mxu0 }
 0x29f   :  { %1124 = vst [vmem:[%s1748_s11] sm:$0xff] %v1119_v58 }

</bundles_post_ra>
